<compile_context>
chip_gen: v5e
topology: v5e:2x2
jax: 0.10.0
libtpu: 0.0.40
codegen_flags: <defaults>
</compile_context>

<pallas_src>
import math
from functools import lru_cache

import jax
import jax.numpy as jnp
from jax.experimental import pallas as pl
from jax.experimental.pallas import tpu as pltpu


def _add_pe_kernel(pe_ref, x_ref, o_ref):
    # pe_ref: (1, tile_n)   x_ref / o_ref: (b_tile, tile_n)
    # Pure VPU broadcast add; entirely hidden under the HBM DMA.
    o_ref[...] = x_ref[...] + pe_ref[...]


@lru_cache(maxsize=16)
def _build_pe_flat(C, H, W, d_model, dtype_name):
    """Batch-invariant encoding, exact mirror of the PyTorch construction,
    flattened to (1, C*H*W). Cached so sin/cos + scatter run once per shape."""
    div_term = jnp.exp(
        jnp.arange(0, d_model // 2, 2, dtype=jnp.float32)
        * (-math.log(10000.0) / d_model)
    )  # (L,)
    y_position = jnp.broadcast_to(
        jnp.arange(H, dtype=jnp.float32)[:, None], (H, W))
    x_position = jnp.broadcast_to(
        jnp.arange(W, dtype=jnp.float32)[None, :], (H, W))
    dt = div_term[:, None, None]  # (L, 1, 1)
    pe = jnp.zeros((C, H, W), jnp.float32)
    pe = pe.at[0:C // 2:2, :, :].set(jnp.sin(y_position[None] * dt))
    pe = pe.at[1:C // 2:2, :, :].set(jnp.cos(x_position[None] * dt))
    # TODO(synk): for bf16/fp8 inputs PyTorch would promote (x + f32 pe) to f32;
    # here pe is cast to x.dtype so the output keeps x's dtype.
    return pe.astype(jnp.dtype(dtype_name)).reshape(1, C * H * W)


def _sublane_multiple(itemsize):
    # f32 -> 8, bf16/f16 -> 16, int8/fp8 -> 32 (sub-32-bit packs along sublanes)
    return {4: 8, 2: 16, 1: 32}.get(itemsize, 8)


def _choose_tiles(B, N, itemsize, target_bytes):
    """Pick (b_tile, tile_n) so one x block moves ~target_bytes (or the whole
    problem when it's small), keeping the lane dim a multiple of 128 (or == N)
    and the sublane dim either == B or a multiple of the dtype pack factor."""
    max_elems = max(128, target_bytes // itemsize)
    if B * N <= max_elems:
        return B, N                       # whole problem in one grid step
    if N <= max_elems:                    # full rows, tile over batch
        sub = _sublane_multiple(itemsize)
        b_tile = min(B, max(1, max_elems // N))
        if b_tile < B and b_tile >= sub:
            b_tile = (b_tile // sub) * sub
        return b_tile, N
    # A single row exceeds the budget: tile the flat C*H*W axis in 128-lane
    # multiples (ragged last block handled by pl.cdiv + Pallas masking).
    tile_n = max(128, (max_elems // 128) * 128)
    return 1, min(tile_n, N)


def positional_encoding_2d(x, d_model, *, target_block_bytes=2 << 20):
    """x: (B, C, H, W); returns x + pe (broadcast over batch), like the module."""
    B, C, H, W = x.shape

    # The PyTorch module only works when the sin/cos channel-slice lengths
    # match len(div_term); assert the same condition instead of clipping.
    n_sin = len(range(0, C // 2, 2))
    n_cos = len(range(1, C // 2, 2))
    n_div = len(range(0, d_model // 2, 2))
    assert n_sin == n_div and n_cos == n_div, (
        f"PositionalEncoding2D: sin/cos slice lengths ({n_sin},{n_cos}) must "
        f"match div_term length ({n_div}); got C={C}, d_model={d_model}"
    )

    N = C * H * W
    itemsize = jnp.dtype(x.dtype).itemsize

    pe = _build_pe_flat(C, H, W, d_model, jnp.dtype(x.dtype).name)  # (1, N)
    x2 = x.reshape(B, N)

    b_tile, tile_n = _choose_tiles(B, N, itemsize, target_block_bytes)
    # pe-varying axis OUTER, batch INNER -> pe block index constant across
    # consecutive inner steps, so it is fetched once per tile_n slab.
    grid = (pl.cdiv(N, tile_n), pl.cdiv(B, b_tile))

    grid_spec = pltpu.PrefetchScalarGridSpec(
        num_scalar_prefetch=0,
        grid=grid,
        in_specs=[
            pl.BlockSpec((1, tile_n), lambda n, b: (0, n)),        # pe
            pl.BlockSpec((b_tile, tile_n), lambda n, b: (b, n)),   # x
        ],
        out_specs=pl.BlockSpec((b_tile, tile_n), lambda n, b: (b, n)),
    )

    cost = pl.CostEstimate(
        flops=B * N,
        transcendentals=0,
        bytes_accessed=(2 * B * N + N) * itemsize,
    )

    out = pl.pallas_call(
        _add_pe_kernel,
        out_shape=jax.ShapeDtypeStruct((B, N), x.dtype),
        grid_spec=grid_spec,
        compiler_params=pltpu.CompilerParams(
            dimension_semantics=("parallel", "parallel")
        ),
        cost_estimate=cost,
    )(pe, x2)

    return out.reshape(B, C, H, W)


def _reference(x, d_model):
    B, C, H, W = x.shape
    div_term = jnp.exp(
        jnp.arange(0, d_model // 2, 2, dtype=jnp.float32)
        * (-math.log(10000.0) / d_model)
    )
    y_position = jnp.tile(jnp.arange(H, dtype=jnp.float32)[:, None], (1, W))
    x_position = jnp.tile(jnp.arange(W, dtype=jnp.float32)[None, :], (H, 1))
    pe = jnp.zeros((C, H, W), jnp.float32)
    dt = div_term[:, None, None]
    pe = pe.at[0:C // 2:2, :, :].set(jnp.sin(y_position[None] * dt))
    pe = pe.at[1:C // 2:2, :, :].set(jnp.cos(x_position[None] * dt))
    return x + pe[None]


if __name__ == "__main__":
    B, C, H, W = 2, 8, 16, 16  # d_model == C; slice lengths match div_term
    key = jax.random.PRNGKey(0)
    x = jax.random.normal(key, (B, C, H, W), dtype=jnp.float32)

    out = positional_encoding_2d(x, d_model=C)
    out = jax.block_until_ready(out)

    ref = _reference(x, d_model=C)
    assert out.shape == (B, C, H, W)
    assert jnp.allclose(out, ref, atol=1e-5, rtol=1e-5)

    print("KERNEL_OK")
</pallas_src>

<mosaic_0001>
module attributes {stable_mosaic.version = 11 : i64} {
  func.func @_add_pe_kernel(%arg0: i32, %arg1: i32, %arg2: memref<1x2048xf32, #tpu.memory_space<vmem>>, %arg3: memref<2x2048xf32, #tpu.memory_space<vmem>>, %arg4: memref<2x2048xf32, #tpu.memory_space<vmem>>) attributes {dimension_semantics = [#tpu.dimension_semantics<parallel>, #tpu.dimension_semantics<parallel>], iteration_bounds = array<i64: 1, 1>, scalar_prefetch = 0 : i64, scratch_operands = 0 : i64, tpu.core_type = #tpu.core_type<tc>, window_params = [{transform_indices = @transform_0, window_bounds = array<i64: 1, 2048>}, {transform_indices = @transform_1, window_bounds = array<i64: 2, 2048>}, {transform_indices = @transform_2, window_bounds = array<i64: 2, 2048>}]} {
    %c0 = arith.constant 0 : index
    %c0_0 = arith.constant 0 : index
    %0 = vector.load %arg3[%c0, %c0_0] : memref<2x2048xf32, #tpu.memory_space<vmem>>, vector<2x2048xf32>
    %c0_1 = arith.constant 0 : index
    %c0_2 = arith.constant 0 : index
    %1 = vector.load %arg2[%c0_1, %c0_2] : memref<1x2048xf32, #tpu.memory_space<vmem>>, vector<1x2048xf32>
    %2 = vector.broadcast %1 : vector<1x2048xf32> to vector<2x2048xf32>
    %3 = arith.addf %0, %2 : vector<2x2048xf32>
    %c0_3 = arith.constant 0 : index
    %c0_4 = arith.constant 0 : index
    %4 = vector.load %arg4[%c0_3, %c0_4] : memref<2x2048xf32, #tpu.memory_space<vmem>>, vector<2x2048xf32>
    tpu.vector_store %arg4[%c0_3, %c0_4], %3 {strides = array<i32>} : memref<2x2048xf32, #tpu.memory_space<vmem>>, vector<2x2048xf32>,
    return
  }
  func.func @transform_0(%arg0: i32, %arg1: i32) -> (i32, i32) {
    %c0_i32 = arith.constant 0 : i32
    %c0_i32_0 = arith.constant 0 : i32
    return %c0_i32, %arg0 : i32, i32
  }
  func.func @transform_1(%arg0: i32, %arg1: i32) -> (i32, i32) {
    %c0_i32 = arith.constant 0 : i32
    return %arg1, %arg0 : i32, i32
  }
  func.func @transform_2(%arg0: i32, %arg1: i32) -> (i32, i32) {
    %c0_i32 = arith.constant 0 : i32
    return %arg1, %arg0 : i32, i32
  }
}

</mosaic_0001>

<bundles_post_ra>
// kernel: tpu_custom_call.1
= control target key start
LH: loop header
LB: loop body
LE: loop exit
PB: predicated region body
PF: predicated region fallthrough
CT: control target
= control target key end

     0   :  { %7 = vsyncpa [#allocation3], 0  ;;  %s241_s0 = inlined_call_operand.hbm [shape: f32[1,2048], index: 0, kind: input, shape index: {}]   ;;  %s242_s1 = inlined_call_operand.hbm [shape: f32[2,2048], index: 1, kind: input, shape index: {}]   ;;  %s243_s2 = inlined_call_operand.hbm [shape: f32[2,2048], index: 2, kind: output, shape index: {}]  }
   0x1   :  { %8 = vsyncpa [#allocation6], 0 }
   0x2   :  { %9 = vsyncpa [#allocation4], 0  ;;  %s15_s11 = sshll.u32 %s241_s0, 4  ;;  %s202_s12 = smov [#allocation2]   ;;  %s16_s11 = int_to_ptr.hbm [resolvable:$true] %s15_s11 }
   0x3   :  { %s17_s13 = sshll.u32 %s202_s12, 4  ;;  %s26_s16 = sshll.u32 %s242_s1, 4  ;;  %s18_s13 = int_to_ptr.vmem [resolvable:$true] %s17_s13  ;;  %s27_s16 = int_to_ptr.hbm [resolvable:$true] %s26_s16 }
   0x4   :  { %20 = dma.hbm_to_vmem [thread:$0]  %s16_s11, 256, %s18_s13, [#allocation3]  }
   0x5   :  { %s203_s17 = smov [#allocation5]  }
   0x6   :  { %s28_s18 = sshll.u32 %s203_s17, 4  ;;  %s29_s18 = int_to_ptr.vmem [resolvable:$true] %s28_s18 }
   0x7   :  { %31 = dma.hbm_to_vmem [thread:$0]  %s27_s16, 512, %s29_s18, [#allocation6]  }
   0x8   :  { %196 = dma.done.wait [#allocation3], 256  }
   0x9   :  { %197 = vsyncadd [#allocation3], 4294967040 }
   0xa   :  { %198 = dma.done.wait [#allocation6], 512  }
   0xb   :  { %199 = vsyncadd [#allocation6], 4294966784  ;;  %v44_v0 = vld [vmem:[#allocation2] sm:$0xff]  ;;  %vm76_vm0 = vcmask 1041408   ;;  %vm78_vm1 = vcmask 1045508   ;;  %vm80_vm2 = vcmask 1043456  }
   0xc   :  { %v48_v1 = vperm.slane %v44_v0, 0  ;;  %v49_v2 = vperm.slane %v44_v0, 1  ;;  %v50_v3 = vperm.slane %v44_v0, 2  ;;  %v51_v4 = vperm.slane %v44_v0, 3  ;;  %v45_v5 = vld [vmem:[#allocation2 + $0x8] sm:$0xff]  ;;  %v40_v14 = vld [vmem:[#allocation5] sm:$0xff] }
   0xd   :  { %v52_v6 = vperm.slane %v44_v0, 4  ;;  %v53_v7 = vperm.slane %v44_v0, 5  ;;  %v54_v8 = vperm.slane %v44_v0, 6  ;;  %v55_v9 = vperm.slane %v44_v0, 7  ;;  %v41_v21 = vld [vmem:[#allocation5 + $0x8] sm:$0xff]  ;;  %v42_v33 = vld [vmem:[#allocation5 + $0x10] sm:$0xff] }
   0xe   :  { %v64_v10 = vrot.slane %v49_v2, 6  ;;  %v65_v11 = vrot.slane %v50_v3, 4  ;;  %v66_v12 = vrot.slane %v51_v4, 2  ;;  %v56_v13 = vperm.slane %v45_v5, 0  ;;  %v43_v45 = vld [vmem:[#allocation5 + $0x18] sm:$0xff]  ;;  %s204_s0 = smov [#allocation7]  }
   0xf   :  { %v67_v15 = vrot.slane %v53_v7, 6  ;;  %v68_v16 = vrot.slane %v54_v8, 4  ;;  %v69_v17 = vrot.slane %v55_v9, 2  ;;  %v57_v18 = vperm.slane %v45_v5, 1  ;;  %s108_s1 = sshll.u32 %s204_s0, 4  ;;  %s110_s21 = sshll.u32 %s243_s2, 4  ;;  %s109_s1 = int_to_ptr.vmem [resolvable:$true] %s108_s1  ;;  %s111_s21 = int_to_ptr.hbm [resolvable:$true] %s110_s21 }
  0x10   :  { %v77_v19 = vsel %vm76_vm0, %v48_v1, %v64_v10  ;;  %v79_v20 = vsel %vm78_vm1, %v65_v11, %v66_v12  ;;  %v58_v22 = vperm.slane %v45_v5, 2  ;;  %v59_v23 = vperm.slane %v45_v5, 3 }
  0x11   :  { %v81_v24 = vsel %vm80_vm2, %v77_v19, %v79_v20  ;;  %v82_v25 = vsel %vm76_vm0, %v52_v6, %v67_v15  ;;  %v83_v26 = vsel %vm78_vm1, %v68_v16, %v69_v17  ;;  %v70_v27 = vrot.slane %v57_v18, 6 }
  0x12   :  { %v95_v28 = vadd.f32 %v81_v24, %v40_v14  ;;  %v84_v29 = vsel %vm80_vm2, %v82_v25, %v83_v26  ;;  %v71_v30 = vrot.slane %v58_v22, 4  ;;  %v72_v31 = vrot.slane %v59_v23, 2 }
  0x13   :  { %v96_v32 = vadd.f32 %v84_v29, %v41_v21  ;;  %v85_v34 = vsel %vm76_vm0, %v56_v13, %v70_v27  ;;  %v60_v35 = vperm.slane %v45_v5, 4  ;;  %v61_v36 = vperm.slane %v45_v5, 5 }
  0x14   :  { %99 = vst [vmem:[#allocation7] sm:$0xff] %v95_v28  ;;  %v86_v37 = vsel %vm78_vm1, %v71_v30, %v72_v31  ;;  %v62_v38 = vperm.slane %v45_v5, 6  ;;  %v63_v39 = vperm.slane %v45_v5, 7 }
  0x15   :  { %100 = vst [vmem:[#allocation7 + $0x8] sm:$0xff] %v96_v32  ;;  %v87_v40 = vsel %vm80_vm2, %v85_v34, %v86_v37  ;;  %v73_v41 = vrot.slane %v61_v36, 6 }
  0x16   :  { %v97_v42 = vadd.f32 %v87_v40, %v42_v33  ;;  %v74_v43 = vrot.slane %v62_v38, 4  ;;  %v75_v44 = vrot.slane %v63_v39, 2 }
  0x17   :  { %v88_v46 = vsel %vm76_vm0, %v60_v35, %v73_v41 }
  0x18   :  { %101 = vst [vmem:[#allocation7 + $0x10] sm:$0xff] %v97_v42  ;;  %v89_v47 = vsel %vm78_vm1, %v74_v43, %v75_v44 }
  0x19   :  { %v90_v48 = vsel %vm80_vm2, %v88_v46, %v89_v47 }
  0x1a   :  { %v98_v49 = vadd.f32 %v90_v48, %v43_v45 }
  0x1c   :  { %102 = vst [vmem:[#allocation7 + $0x18] sm:$0xff] %v98_v49 }
  0x1d   :  { %113 = dma.vmem_to_hbm [thread:$0]  %s109_s1, 512, %s111_s21, [#allocation4]  }
  0x1e   :  { %200 = dma.done.wait [#allocation4], 512  }
  0x1f   :  { %201 = vsyncadd [#allocation4], 4294966784 }
  0x20   :  { %118 = vsyncpa [#allocation3], 1 }
  0x21   :  { %119 = vsyncpa [#allocation6], 1 }
  0x22   :  { %120 = vsyncpa [#allocation4], 1 }

</bundles_post_ra>
